<compile_context>
chip_gen: v7x
topology: tpu7x:2x2x1
jax: 0.10.0
libtpu: 0.0.40
codegen_flags: <defaults>
</compile_context>

<pallas_src>
from types import SimpleNamespace

import jax
import jax.numpy as jnp
from jax.experimental import pallas as pl
from jax.experimental.pallas import tpu as pltpu


def _center_gram_kernel(feat_ref, f2_ref, cent_ref, c2_ref, labels_ref, attn_ref,
                        iv_ref, distlab_ref, cost_ref):
    """One batch-row tile: GT-center distance per frame + partial Gram cost.

    feat_ref   : (TBT, C)      bf16  frame features (TBT = TILE_B * T)
    f2_ref     : (TBT, 1)      f32   exact ||f||^2 (wrapper-precomputed)
    cent_ref   : (NC_pad, C)   bf16  -2 * zero-padded class centers (resident)
    c2_ref     : (1, NC_pad)   f32   ||center||^2 of the unscaled centers (resident)
    labels_ref : (TBT, 1)      i32   per-frame GT class
    attn_ref   : (TILE_B, T)   f32   raw attention
    iv_ref     : (TILE_B, 1)   f32   1.0 iff 'dataset_video' sample
    distlab_ref: (1, TBT)      f32   GT-class distance, lane-dense
    cost_ref   : (8, 128)      f32   per-tile Gram-MSE numerator (broadcast scalar)
    """
    # MXU: fc = f · (-2 c)^T, contracting the last dim of both operands (no transpose),
    # bf16 operands with f32 accumulation.
    fc = jax.lax.dot_general(
        feat_ref[...], cent_ref[...],
        dimension_numbers=(((1,), (1,)), ((), ())),
        preferred_element_type=jnp.float32)                      # (TBT, NC_pad) = -2 f·c

    # Fused masked gather of the GT-class distance: the (TBT, NC_pad) distance plane
    # is never materialized (no float one-hot, no dm temp); padded classes never match.
    labels = labels_ref[...]                                     # (TBT, 1) i32
    classes = jax.lax.broadcasted_iota(jnp.int32, fc.shape, 1)
    dlab = f2_ref[...] + jnp.sum(
        jnp.where(labels == classes, c2_ref[...] + fc, 0.0),
        axis=1, keepdims=True)                                   # (TBT, 1)

    tb, t = attn_ref.shape
    d_bt = dlab.reshape(tb, t)                   # single relayout of the column
    distlab_ref[...] = d_bt.reshape(1, tb * t)   # lane-dense store derived from d_bt

    # Gram MSE closed form per row: sum_{t,t'} (a_t a_t' - d_t d_t')^2
    #                             = (Σa²)² − 2(Σ a·d)² + (Σd²)²
    a = 1.0 - attn_ref[...]
    iv = iv_ref[...]
    na = (a - jnp.mean(a, axis=1, keepdims=True)) * iv
    nd0 = d_bt - jnp.mean(d_bt, axis=1, keepdims=True) + 1e-5
    nd = nd0 * iv * jax.lax.rsqrt(jnp.sum(nd0 * nd0, axis=1, keepdims=True))
    saa = jnp.sum(na * na, axis=1, keepdims=True)                # (TILE_B, 1)
    sdd = jnp.sum(nd * nd, axis=1, keepdims=True)
    sad = jnp.sum(na * nd, axis=1, keepdims=True)
    part = saa * saa - 2.0 * sad * sad + sdd * sdd
    # Full unmasked (8, 128) store of the per-tile scalar (no masked vst.msk).
    cost_ref[...] = jnp.broadcast_to(jnp.sum(part, keepdims=True), cost_ref.shape)


def _tpu_generation():
    """Best-effort TPU generation from the device-kind string."""
    try:
        kind = jax.devices()[0].device_kind.lower()
    except Exception:
        return 6
    if "v7" in kind or "7x" in kind:
        return 7
    if "v5 lite" in kind or "v5e" in kind or "v5lite" in kind:
        return 5
    if "v6" in kind:
        return 6
    return 6


def _physical_vmem_bytes():
    try:
        return int(pltpu.get_tpu_info().vmem_capacity_bytes)
    except Exception:
        return None


def _plan(B, T, C, NC_pad):
    """Generation-aware whole-row tile size + VMEM limit."""
    gen = _tpu_generation()
    if gen >= 7:
        # 64 MiB VMEM, 2 TensorCores: smaller tiles, tight cap, force >= 2 grid steps.
        target_rows, vmem_cap, min_tiles = 1024, 48 * 2**20, 2
    else:
        # v5e / v6e: 128 MiB VMEM, 1 TC: bigger tiles amortize per-grid-step overhead
        # and get closer to the HBM roofline.
        target_rows, vmem_cap, min_tiles = 2048, 100 * 2**20, 1
    phys = _physical_vmem_bytes()
    if phys is not None:
        vmem_cap = min(vmem_cap, max(16 * 2**20, phys - 16 * 2**20))

    # Multi-tile alignment: TILE_B % 8 == 0 (attn/iv sublane blocks) and
    # (TILE_B*T) % 128 == 0 (lane-dense distlab output blocks).
    step = 8
    while (step * T) % 128 != 0:
        step += 8

    def tile_bytes(tb):
        tbt = tb * T
        io = (2 * tbt * C * 2                 # bf16 feature double buffer
              + 4 * tbt * 4                   # ||f||^2 + labels (double buffered)
              + 2 * tbt * 4 + 2 * tb * 4      # attn + video indicator
              + NC_pad * C * 2 + NC_pad * 4   # resident centers / ||c||^2
              + 2 * tbt * 4 + 2 * 8 * 128 * 4)  # distlab + cost outputs
        return io + 3 * tbt * NC_pad * 4      # masked-reduce temporaries

    tb = max(1, target_rows // max(T, 1))
    while tb > step and tile_bytes(tb) > vmem_cap:   # keep intermediates resident
        tb = max(step, tb - step)

    if tb >= B:
        tb = B                                        # whole batch in one tile
        if min_tiles > 1 and B >= min_tiles * step:
            # Split across TensorCores when alignment allows it (v7x megacore).
            cand = ((-(-B // min_tiles) + step - 1) // step) * step
            if cand < B:
                tb = cand
    else:
        tb = max(step, (tb // step) * step)

    vmem_limit = int(min(vmem_cap, max(16 * 2**20, tile_bytes(tb) + 4 * 2**20)))
    return tb, vmem_limit


def _pad_rows(x, rows):
    pad = rows - x.shape[0]
    if pad == 0:
        return x
    return jnp.concatenate([x, jnp.zeros((pad,) + x.shape[1:], x.dtype)], axis=0)


def center_gram_loss(features, attn, labels, indexes_2d, indexes_video,
                     centers, center_weight):
    """Pallas implementation of CenterGramLoss.forward. Returns (loss, distmat[B, T])."""
    B, T, C = features.shape
    NC = centers.shape[0]
    NC_pad = max(128, ((NC + 127) // 128) * 128)      # lane-dense class dim

    TILE_B, vmem_limit = _plan(B, T, C, NC_pad)
    num_tiles = -(-B // TILE_B)
    B_pad = num_tiles * TILE_B
    TBT = TILE_B * T

    feat_f32 = features.astype(jnp.float32).reshape(B * T, C)
    f2 = _pad_rows(jnp.sum(feat_f32 * feat_f32, axis=1, keepdims=True), B_pad * T)  # exact f32
    feat_bf16 = _pad_rows(feat_f32.astype(jnp.bfloat16), B_pad * T)                 # halved HBM stream

    centers_f32 = centers.astype(jnp.float32)
    cent_pad = jnp.zeros((NC_pad, C), jnp.float32).at[:NC].set(centers_f32)
    cent_neg2_bf16 = (-2.0 * cent_pad).astype(jnp.bfloat16)      # -2 folded into the MXU operand
    c2 = jnp.sum(cent_pad * cent_pad, axis=1)[None, :]           # (1, NC_pad) f32, computed once

    labels_pad = _pad_rows(labels.astype(jnp.int32), B_pad)
    labels_bt = jnp.broadcast_to(labels_pad[:, None], (B_pad, T)).reshape(B_pad * T, 1)

    attn2d = _pad_rows(attn.reshape(B, T).astype(jnp.float32), B_pad)
    iv = _pad_rows(indexes_video.astype(jnp.float32), B_pad)[:, None]   # (B_pad, 1)

    def run(single_buffer_resident):
        if single_buffer_resident:
            cent_spec = pl.BlockSpec((NC_pad, C), lambda i: (0, 0),
                                     pipeline_mode=pl.Buffered(1))
            c2_spec = pl.BlockSpec((1, NC_pad), lambda i: (0, 0),
                                   pipeline_mode=pl.Buffered(1))
        else:
            cent_spec = pl.BlockSpec((NC_pad, C), lambda i: (0, 0))
            c2_spec = pl.BlockSpec((1, NC_pad), lambda i: (0, 0))
        return pl.pallas_call(
            _center_gram_kernel,
            out_shape=(jax.ShapeDtypeStruct((1, B_pad * T), jnp.float32),
                       jax.ShapeDtypeStruct((num_tiles * 8, 128), jnp.float32)),
            grid=(num_tiles,),
            in_specs=[
                pl.BlockSpec((TBT, C), lambda i: (i, 0)),        # bf16 features tile
                pl.BlockSpec((TBT, 1), lambda i: (i, 0)),        # exact ||f||^2
                cent_spec,                                       # -2*centers (resident)
                c2_spec,                                         # ||c||^2 (resident)
                pl.BlockSpec((TBT, 1), lambda i: (i, 0)),        # labels
                pl.BlockSpec((TILE_B, T), lambda i: (i, 0)),     # attention
                pl.BlockSpec((TILE_B, 1), lambda i: (i, 0)),     # video indicator
            ],
            out_specs=(pl.BlockSpec((1, TBT), lambda i: (0, i)),     # lane-dense distlab
                       pl.BlockSpec((8, 128), lambda i: (i, 0))),    # padded per-tile cost
            compiler_params=pltpu.CompilerParams(
                dimension_semantics=("parallel",),
                vmem_limit_bytes=vmem_limit),
        )(feat_bf16, f2, cent_neg2_bf16, c2, labels_bt, attn2d, iv)

    try:
        distlab_flat, cost_part = run(True)
    except Exception:
        # Older JAX without BlockSpec pipeline_mode / Buffered(1): plain resident specs.
        distlab_flat, cost_part = run(False)

    distg = distlab_flat.reshape(B_pad, T)[:B]                   # (B, T) returned distmat

    # Center loss reassembled from the gathered distances (the masked (B*T, NC)
    # plane is never materialized or reduced):
    #   num = Σ_{2D frames} clamp(d_gt, 1e-12, 1e12) + 1e-12 * (#zeroed entries)
    #   den = mask.sum() = T * (#2D samples)      -- exactly the torch semantics
    # NOTE: assumes all labels are valid (< num_classes), same as the torch gather.
    idx2d_f = indexes_2d.astype(jnp.float32)
    n2d = jnp.sum(idx2d_f)
    num = (jnp.sum(jnp.clip(distg, 1e-12, 1e12) * idx2d_f[:, None])
           + 1e-12 * (B * T * NC - T * n2d))
    den = T * n2d
    center_loss = num / (den + 1e-5) * center_weight

    cost = jnp.sum(cost_part[0::8, 0]) / float(B * T * T) * 100.0    # mse_loss(...) * 100
    return center_loss + cost, distg


def center_gram_loss_reference(features, attn, labels, indexes_2d, indexes_video,
                               centers, center_weight):
    """Pure-JAX reference mirroring the PyTorch forward (mask expanded to (B, T, NC))."""
    B, T, C = features.shape
    NC = centers.shape[0]
    f = features.reshape(B * T, C)
    dm = (jnp.sum(f ** 2, axis=1, keepdims=True)
          + jnp.sum(centers ** 2, axis=1)[None, :]
          - 2.0 * jnp.dot(f, centers.T, precision=jax.lax.Precision.HIGHEST))
    dm = dm.reshape(B, T, NC)

    classes = jnp.arange(NC)
    mask = (jnp.broadcast_to(labels[:, None, None] == classes[None, None, :], (B, T, NC))
            & jnp.broadcast_to(indexes_2d[:, None, None], (B, T, NC)))
    maskf = mask.astype(jnp.float32)
    loss = jnp.clip(dm * maskf, 1e-12, 1e12).sum() / (maskf.sum() + 1e-5) * center_weight

    a = 1.0 - attn[..., 0]
    inds = jnp.broadcast_to(labels[:, None, None], (B, T, 1))
    dg = jnp.take_along_axis(dm, inds, axis=2)[..., 0]
    iv = indexes_video.astype(jnp.float32)[:, None]
    na = (a - jnp.mean(a, axis=1, keepdims=True)) * iv
    nd0 = dg - jnp.mean(dg, axis=1, keepdims=True) + 1e-5
    nd = nd0 * iv / jnp.sqrt(jnp.sum(nd0 ** 2, axis=1, keepdims=True))
    ga = na[:, :, None] * na[:, None, :]
    gd = nd[:, :, None] * nd[:, None, :]
    cost = jnp.mean((ga - gd) ** 2) * 100.0
    return loss + cost, dg


if __name__ == "__main__":
    cfg = SimpleNamespace(CENTER_WEIGHT=0.5)
    num_classes, feat_dim = 10, 32
    B, T = 2, 8

    key = jax.random.PRNGKey(0)
    k_feat, k_attn, k_lab, k_cent = jax.random.split(key, 4)

    # info_dict['features'], info_dict['attn'], labels['Pathology'], parameter `centers`
    features = jax.random.normal(k_feat, (B, T, feat_dim), jnp.float32)
    attn = jax.random.uniform(k_attn, (B, T, 1), jnp.float32)
    labels = jax.random.randint(k_lab, (B,), 0, num_classes, jnp.int32)
    centers = jax.random.normal(k_cent, (num_classes, feat_dim), jnp.float32)

    # file-name string parsing stays host-side Python glue (same as the torch list comp)
    file_names = ["dataset_image_0001.png", "dataset_video_0002.mp4"]
    indexes_2d = jnp.array(["dataset_image" in f.lower() for f in file_names])
    indexes_video = jnp.array(["dataset_video" in f.lower() for f in file_names])

    loss, distmat = center_gram_loss(features, attn, labels, indexes_2d,
                                     indexes_video, centers, cfg.CENTER_WEIGHT)
    jax.block_until_ready((loss, distmat))

    ref_loss, ref_dist = center_gram_loss_reference(features, attn, labels, indexes_2d,
                                                    indexes_video, centers,
                                                    cfg.CENTER_WEIGHT)
    assert jnp.allclose(loss, ref_loss, rtol=2e-2, atol=2e-2), (loss, ref_loss)
    assert jnp.allclose(distmat, ref_dist, rtol=2e-2, atol=2e-2)
    print("KERNEL_OK")
</pallas_src>

<mosaic_0001>
module attributes {stable_mosaic.version = 11 : i64} {
  func.func @_center_gram_kernel(%arg0: i32, %arg1: memref<16x32xbf16, #tpu.memory_space<vmem>>, %arg2: memref<16x1xf32, #tpu.memory_space<vmem>>, %arg3: memref<128x32xbf16, #tpu.memory_space<vmem>>, %arg4: memref<1x128xf32, #tpu.memory_space<vmem>>, %arg5: memref<16x1xi32, #tpu.memory_space<vmem>>, %arg6: memref<2x8xf32, #tpu.memory_space<vmem>>, %arg7: memref<2x1xf32, #tpu.memory_space<vmem>>, %arg8: memref<1x16xf32, #tpu.memory_space<vmem>>, %arg9: memref<8x128xf32, #tpu.memory_space<vmem>>) attributes {dimension_semantics = [#tpu.dimension_semantics<parallel>], iteration_bounds = array<i64: 1>, scalar_prefetch = 0 : i64, scratch_operands = 0 : i64, tpu.core_type = #tpu.core_type<tc>, window_params = [{transform_indices = @transform_0, window_bounds = array<i64: 16, 32>}, {transform_indices = @transform_1, window_bounds = array<i64: 16, 1>}, {pipeline_mode = #tpu.pipeline_mode<synchronous>, transform_indices = @transform_2, window_bounds = array<i64: 128, 32>}, {pipeline_mode = #tpu.pipeline_mode<synchronous>, transform_indices = @transform_3, window_bounds = array<i64: 1, 128>}, {transform_indices = @transform_4, window_bounds = array<i64: 16, 1>}, {transform_indices = @transform_5, window_bounds = array<i64: 2, 8>}, {transform_indices = @transform_6, window_bounds = array<i64: 2, 1>}, {transform_indices = @transform_7, window_bounds = array<i64: 1, 16>}, {transform_indices = @transform_8, window_bounds = array<i64: 8, 128>}]} {
    %c0 = arith.constant 0 : index
    %c0_0 = arith.constant 0 : index
    %0 = vector.load %arg1[%c0, %c0_0] : memref<16x32xbf16, #tpu.memory_space<vmem>>, vector<16x32xbf16>
    %c0_1 = arith.constant 0 : index
    %c0_2 = arith.constant 0 : index
    %1 = vector.load %arg3[%c0_1, %c0_2] : memref<128x32xbf16, #tpu.memory_space<vmem>>, vector<128x32xbf16>
    %cst = arith.constant dense<0.000000e+00> : vector<16x128xf32>
    %2 = tpu.matmul %0, %1, %cst {dimension_numbers = #tpu.dot_dimension_numbers<[1], [1], [0], [0], [0, 0, 1, 0], [], []>} : vector<16x32xbf16>, vector<128x32xbf16>, vector<16x128xf32> -> vector<16x128xf32>
    %c0_3 = arith.constant 0 : index
    %c0_4 = arith.constant 0 : index
    %3 = vector.load %arg5[%c0_3, %c0_4] : memref<16x1xi32, #tpu.memory_space<vmem>>, vector<16x1xi32>
    %4 = tpu.iota {dimensions = array<i32: 1>} : vector<16x128xi32>
    %c0_5 = arith.constant 0 : index
    %c0_6 = arith.constant 0 : index
    %5 = vector.load %arg2[%c0_5, %c0_6] : memref<16x1xf32, #tpu.memory_space<vmem>>, vector<16x1xf32>
    %6 = vector.broadcast %3 : vector<16x1xi32> to vector<16x128xi32>
    %7 = arith.cmpi eq, %6, %4 : vector<16x128xi32>
    %c0_7 = arith.constant 0 : index
    %c0_8 = arith.constant 0 : index
    %8 = vector.load %arg4[%c0_7, %c0_8] : memref<1x128xf32, #tpu.memory_space<vmem>>, vector<1x128xf32>
    %9 = vector.broadcast %8 : vector<1x128xf32> to vector<16x128xf32>
    %10 = arith.addf %9, %2 : vector<16x128xf32>
    %cst_9 = arith.constant 0.000000e+00 : f32
    %11 = vector.broadcast %cst_9 : f32 to vector<16x128xf32>
    %12 = arith.select %7, %10, %11 : vector<16x128xi1>, vector<16x128xf32>
    %cst_10 = arith.constant dense<0.000000e+00> : vector<16xf32>
    %13 = vector.multi_reduction <add>, %12, %cst_10 [1] : vector<16x128xf32> to vector<16xf32>
    %14 = vector.shape_cast %13 : vector<16xf32> to vector<16x1xf32>
    %15 = arith.addf %5, %14 : vector<16x1xf32>
    %16 = vector.shape_cast %15 : vector<16x1xf32> to vector<2x8xf32>
    %17 = vector.shape_cast %16 : vector<2x8xf32> to vector<1x16xf32>
    %c0_11 = arith.constant 0 : index
    %c0_12 = arith.constant 0 : index
    %18 = vector.load %arg8[%c0_11, %c0_12] : memref<1x16xf32, #tpu.memory_space<vmem>>, vector<1x16xf32>
    tpu.vector_store %arg8[%c0_11, %c0_12], %17 {strides = array<i32>} : memref<1x16xf32, #tpu.memory_space<vmem>>, vector<1x16xf32>,
    %c0_13 = arith.constant 0 : index
    %c0_14 = arith.constant 0 : index
    %19 = vector.load %arg6[%c0_13, %c0_14] : memref<2x8xf32, #tpu.memory_space<vmem>>, vector<2x8xf32>
    %cst_15 = arith.constant 1.000000e+00 : f32
    %20 = vector.broadcast %cst_15 : f32 to vector<2x8xf32>
    %21 = arith.subf %20, %19 : vector<2x8xf32>
    %c0_16 = arith.constant 0 : index
    %c0_17 = arith.constant 0 : index
    %22 = vector.load %arg7[%c0_16, %c0_17] : memref<2x1xf32, #tpu.memory_space<vmem>>, vector<2x1xf32>
    %cst_18 = arith.constant dense<0.000000e+00> : vector<2xf32>
    %23 = vector.multi_reduction <add>, %21, %cst_18 [1] : vector<2x8xf32> to vector<2xf32>
    %24 = vector.shape_cast %23 : vector<2xf32> to vector<2x1xf32>
    %cst_19 = arith.constant 8.000000e+00 : f32
    %25 = vector.broadcast %cst_19 : f32 to vector<2x1xf32>
    %26 = arith.divf %24, %25 : vector<2x1xf32>
    %27 = vector.broadcast %26 : vector<2x1xf32> to vector<2x8xf32>
    %28 = arith.subf %21, %27 : vector<2x8xf32>
    %29 = vector.broadcast %22 : vector<2x1xf32> to vector<2x8xf32>
    %30 = arith.mulf %28, %29 : vector<2x8xf32>
    %cst_20 = arith.constant dense<0.000000e+00> : vector<2xf32>
    %31 = vector.multi_reduction <add>, %16, %cst_20 [1] : vector<2x8xf32> to vector<2xf32>
    %32 = vector.shape_cast %31 : vector<2xf32> to vector<2x1xf32>
    %cst_21 = arith.constant 8.000000e+00 : f32
    %33 = vector.broadcast %cst_21 : f32 to vector<2x1xf32>
    %34 = arith.divf %32, %33 : vector<2x1xf32>
    %35 = vector.broadcast %34 : vector<2x1xf32> to vector<2x8xf32>
    %36 = arith.subf %16, %35 : vector<2x8xf32>
    %cst_22 = arith.constant 9.99999974E-6 : f32
    %37 = vector.broadcast %cst_22 : f32 to vector<2x8xf32>
    %38 = arith.addf %36, %37 : vector<2x8xf32>
    %39 = vector.broadcast %22 : vector<2x1xf32> to vector<2x8xf32>
    %40 = arith.mulf %38, %39 : vector<2x8xf32>
    %41 = arith.mulf %38, %38 : vector<2x8xf32>
    %cst_23 = arith.constant dense<0.000000e+00> : vector<2xf32>
    %42 = vector.multi_reduction <add>, %41, %cst_23 [1] : vector<2x8xf32> to vector<2xf32>
    %43 = vector.shape_cast %42 : vector<2xf32> to vector<2x1xf32>
    %44 = math.rsqrt %43 : vector<2x1xf32>
    %45 = vector.broadcast %44 : vector<2x1xf32> to vector<2x8xf32>
    %46 = arith.mulf %40, %45 : vector<2x8xf32>
    %47 = arith.mulf %30, %30 : vector<2x8xf32>
    %cst_24 = arith.constant dense<0.000000e+00> : vector<2xf32>
    %48 = vector.multi_reduction <add>, %47, %cst_24 [1] : vector<2x8xf32> to vector<2xf32>
    %49 = vector.shape_cast %48 : vector<2xf32> to vector<2x1xf32>
    %50 = arith.mulf %46, %46 : vector<2x8xf32>
    %cst_25 = arith.constant dense<0.000000e+00> : vector<2xf32>
    %51 = vector.multi_reduction <add>, %50, %cst_25 [1] : vector<2x8xf32> to vector<2xf32>
    %52 = vector.shape_cast %51 : vector<2xf32> to vector<2x1xf32>
    %53 = arith.mulf %30, %46 : vector<2x8xf32>
    %cst_26 = arith.constant dense<0.000000e+00> : vector<2xf32>
    %54 = vector.multi_reduction <add>, %53, %cst_26 [1] : vector<2x8xf32> to vector<2xf32>
    %55 = vector.shape_cast %54 : vector<2xf32> to vector<2x1xf32>
    %56 = arith.mulf %49, %49 : vector<2x1xf32>
    %cst_27 = arith.constant 2.000000e+00 : f32
    %57 = vector.broadcast %cst_27 : f32 to vector<2x1xf32>
    %58 = arith.mulf %57, %55 : vector<2x1xf32>
    %59 = arith.mulf %58, %55 : vector<2x1xf32>
    %60 = arith.subf %56, %59 : vector<2x1xf32>
    %61 = arith.mulf %52, %52 : vector<2x1xf32>
    %62 = arith.addf %60, %61 : vector<2x1xf32>
    %63 = vector.shape_cast %62 : vector<2x1xf32> to vector<1x2x1xf32>
    %cst_28 = arith.constant dense<0.000000e+00> : vector<1xf32>
    %64 = vector.multi_reduction <add>, %63, %cst_28 [1, 2] : vector<1x2x1xf32> to vector<1xf32>
    %65 = vector.shape_cast %64 : vector<1xf32> to vector<1x1x1xf32>
    %66 = vector.extract %65[0, 0, 0] : f32 from vector<1x1x1xf32>
    %67 = vector.broadcast %66 : f32 to vector<1x1xf32>
    %68 = vector.shape_cast %67 : vector<1x1xf32> to vector<1x1xf32>
    %69 = vector.broadcast %68 : vector<1x1xf32> to vector<8x128xf32>
    %c0_29 = arith.constant 0 : index
    %c0_30 = arith.constant 0 : index
    %70 = vector.load %arg9[%c0_29, %c0_30] : memref<8x128xf32, #tpu.memory_space<vmem>>, vector<8x128xf32>
    tpu.vector_store %arg9[%c0_29, %c0_30], %69 {strides = array<i32>} : memref<8x128xf32, #tpu.memory_space<vmem>>, vector<8x128xf32>,
    return
  }
  func.func @transform_0(%arg0: i32) -> (i32, i32) {
    %c0_i32 = arith.constant 0 : i32
    %c0_i32_0 = arith.constant 0 : i32
    return %arg0, %c0_i32 : i32, i32
  }
  func.func @transform_1(%arg0: i32) -> (i32, i32) {
    %c0_i32 = arith.constant 0 : i32
    %c0_i32_0 = arith.constant 0 : i32
    return %arg0, %c0_i32 : i32, i32
  }
  func.func @transform_2(%arg0: i32) -> (i32, i32) {
    %c0_i32 = arith.constant 0 : i32
    %c0_i32_0 = arith.constant 0 : i32
    %c0_i32_1 = arith.constant 0 : i32
    return %c0_i32, %c0_i32_0 : i32, i32
  }
  func.func @transform_3(%arg0: i32) -> (i32, i32) {
    %c0_i32 = arith.constant 0 : i32
    %c0_i32_0 = arith.constant 0 : i32
    %c0_i32_1 = arith.constant 0 : i32
    return %c0_i32, %c0_i32_0 : i32, i32
  }
  func.func @transform_4(%arg0: i32) -> (i32, i32) {
    %c0_i32 = arith.constant 0 : i32
    %c0_i32_0 = arith.constant 0 : i32
    return %arg0, %c0_i32 : i32, i32
  }
  func.func @transform_5(%arg0: i32) -> (i32, i32) {
    %c0_i32 = arith.constant 0 : i32
    %c0_i32_0 = arith.constant 0 : i32
    return %arg0, %c0_i32 : i32, i32
  }
  func.func @transform_6(%arg0: i32) -> (i32, i32) {
    %c0_i32 = arith.constant 0 : i32
    %c0_i32_0 = arith.constant 0 : i32
    return %arg0, %c0_i32 : i32, i32
  }
  func.func @transform_7(%arg0: i32) -> (i32, i32) {
    %c0_i32 = arith.constant 0 : i32
    %c0_i32_0 = arith.constant 0 : i32
    return %c0_i32, %arg0 : i32, i32
  }
  func.func @transform_8(%arg0: i32) -> (i32, i32) {
    %c0_i32 = arith.constant 0 : i32
    %c0_i32_0 = arith.constant 0 : i32
    return %arg0, %c0_i32 : i32, i32
  }
}

module attributes {stable_mosaic.version = 11 : i64} {
  func.func @_center_gram_kernel(%arg0: i32, %arg1: memref<16x32xbf16, #tpu.memory_space<vmem>>, %arg2: memref<16x1xf32, #tpu.memory_space<vmem>>, %arg3: memref<128x32xbf16, #tpu.memory_space<vmem>>, %arg4: memref<1x128xf32, #tpu.memory_space<vmem>>, %arg5: memref<16x1xi32, #tpu.memory_space<vmem>>, %arg6: memref<2x8xf32, #tpu.memory_space<vmem>>, %arg7: memref<2x1xf32, #tpu.memory_space<vmem>>, %arg8: memref<1x16xf32, #tpu.memory_space<vmem>>, %arg9: memref<8x128xf32, #tpu.memory_space<vmem>>) attributes {dimension_semantics = [#tpu.dimension_semantics<parallel>], iteration_bounds = array<i64: 1>, scalar_prefetch = 0 : i64, scratch_operands = 0 : i64, tpu.core_type = #tpu.core_type<tc>, window_params = [{transform_indices = @transform_0, window_bounds = array<i64: 16, 32>}, {transform_indices = @transform_1, window_bounds = array<i64: 16, 1>}, {pipeline_mode = #tpu.pipeline_mode<synchronous>, transform_indices = @transform_2, window_bounds = array<i64: 128, 32>}, {pipeline_mode = #tpu.pipeline_mode<synchronous>, transform_indices = @transform_3, window_bounds = array<i64: 1, 128>}, {transform_indices = @transform_4, window_bounds = array<i64: 16, 1>}, {transform_indices = @transform_5, window_bounds = array<i64: 2, 8>}, {transform_indices = @transform_6, window_bounds = array<i64: 2, 1>}, {transform_indices = @transform_7, window_bounds = array<i64: 1, 16>}, {transform_indices = @transform_8, window_bounds = array<i64: 8, 128>}]} {
    %c0 = arith.constant 0 : index
    %c0_0 = arith.constant 0 : index
    %0 = vector.load %arg1[%c0, %c0_0] : memref<16x32xbf16, #tpu.memory_space<vmem>>, vector<16x32xbf16>
    %c0_1 = arith.constant 0 : index
    %c0_2 = arith.constant 0 : index
    %1 = vector.load %arg3[%c0_1, %c0_2] : memref<128x32xbf16, #tpu.memory_space<vmem>>, vector<128x32xbf16>
    %cst = arith.constant dense<0.000000e+00> : vector<16x128xf32>
    %2 = tpu.matmul %0, %1, %cst {dimension_numbers = #tpu.dot_dimension_numbers<[1], [1], [0], [0], [0, 0, 1, 0], [], []>} : vector<16x32xbf16>, vector<128x32xbf16>, vector<16x128xf32> -> vector<16x128xf32>
    %c0_3 = arith.constant 0 : index
    %c0_4 = arith.constant 0 : index
    %3 = vector.load %arg5[%c0_3, %c0_4] : memref<16x1xi32, #tpu.memory_space<vmem>>, vector<16x1xi32>
    %4 = tpu.iota {dimensions = array<i32: 1>} : vector<16x128xi32>
    %c0_5 = arith.constant 0 : index
    %c0_6 = arith.constant 0 : index
    %5 = vector.load %arg2[%c0_5, %c0_6] : memref<16x1xf32, #tpu.memory_space<vmem>>, vector<16x1xf32>
    %6 = vector.broadcast %3 : vector<16x1xi32> to vector<16x128xi32>
    %7 = arith.cmpi eq, %6, %4 : vector<16x128xi32>
    %c0_7 = arith.constant 0 : index
    %c0_8 = arith.constant 0 : index
    %8 = vector.load %arg4[%c0_7, %c0_8] : memref<1x128xf32, #tpu.memory_space<vmem>>, vector<1x128xf32>
    %9 = vector.broadcast %8 : vector<1x128xf32> to vector<16x128xf32>
    %10 = arith.addf %9, %2 : vector<16x128xf32>
    %cst_9 = arith.constant 0.000000e+00 : f32
    %11 = vector.broadcast %cst_9 : f32 to vector<16x128xf32>
    %12 = arith.select %7, %10, %11 : vector<16x128xi1>, vector<16x128xf32>
    %cst_10 = arith.constant dense<0.000000e+00> : vector<16xf32>
    %13 = vector.multi_reduction <add>, %12, %cst_10 [1] : vector<16x128xf32> to vector<16xf32>
    %14 = vector.shape_cast %13 : vector<16xf32> to vector<16x1xf32>
    %15 = arith.addf %5, %14 : vector<16x1xf32>
    %16 = vector.shape_cast %15 : vector<16x1xf32> to vector<2x8xf32>
    %17 = vector.shape_cast %16 : vector<2x8xf32> to vector<1x16xf32>
    %c0_11 = arith.constant 0 : index
    %c0_12 = arith.constant 0 : index
    %18 = vector.load %arg8[%c0_11, %c0_12] : memref<1x16xf32, #tpu.memory_space<vmem>>, vector<1x16xf32>
    tpu.vector_store %arg8[%c0_11, %c0_12], %17 {strides = array<i32>} : memref<1x16xf32, #tpu.memory_space<vmem>>, vector<1x16xf32>,
    %c0_13 = arith.constant 0 : index
    %c0_14 = arith.constant 0 : index
    %19 = vector.load %arg6[%c0_13, %c0_14] : memref<2x8xf32, #tpu.memory_space<vmem>>, vector<2x8xf32>
    %cst_15 = arith.constant 1.000000e+00 : f32
    %20 = vector.broadcast %cst_15 : f32 to vector<2x8xf32>
    %21 = arith.subf %20, %19 : vector<2x8xf32>
    %c0_16 = arith.constant 0 : index
    %c0_17 = arith.constant 0 : index
    %22 = vector.load %arg7[%c0_16, %c0_17] : memref<2x1xf32, #tpu.memory_space<vmem>>, vector<2x1xf32>
    %cst_18 = arith.constant dense<0.000000e+00> : vector<2xf32>
    %23 = vector.multi_reduction <add>, %21, %cst_18 [1] : vector<2x8xf32> to vector<2xf32>
    %24 = vector.shape_cast %23 : vector<2xf32> to vector<2x1xf32>
    %cst_19 = arith.constant 8.000000e+00 : f32
    %25 = vector.broadcast %cst_19 : f32 to vector<2x1xf32>
    %26 = arith.divf %24, %25 : vector<2x1xf32>
    %27 = vector.broadcast %26 : vector<2x1xf32> to vector<2x8xf32>
    %28 = arith.subf %21, %27 : vector<2x8xf32>
    %29 = vector.broadcast %22 : vector<2x1xf32> to vector<2x8xf32>
    %30 = arith.mulf %28, %29 : vector<2x8xf32>
    %cst_20 = arith.constant dense<0.000000e+00> : vector<2xf32>
    %31 = vector.multi_reduction <add>, %16, %cst_20 [1] : vector<2x8xf32> to vector<2xf32>
    %32 = vector.shape_cast %31 : vector<2xf32> to vector<2x1xf32>
    %cst_21 = arith.constant 8.000000e+00 : f32
    %33 = vector.broadcast %cst_21 : f32 to vector<2x1xf32>
    %34 = arith.divf %32, %33 : vector<2x1xf32>
    %35 = vector.broadcast %34 : vector<2x1xf32> to vector<2x8xf32>
    %36 = arith.subf %16, %35 : vector<2x8xf32>
    %cst_22 = arith.constant 9.99999974E-6 : f32
    %37 = vector.broadcast %cst_22 : f32 to vector<2x8xf32>
    %38 = arith.addf %36, %37 : vector<2x8xf32>
    %39 = vector.broadcast %22 : vector<2x1xf32> to vector<2x8xf32>
    %40 = arith.mulf %38, %39 : vector<2x8xf32>
    %41 = arith.mulf %38, %38 : vector<2x8xf32>
    %cst_23 = arith.constant dense<0.000000e+00> : vector<2xf32>
    %42 = vector.multi_reduction <add>, %41, %cst_23 [1] : vector<2x8xf32> to vector<2xf32>
    %43 = vector.shape_cast %42 : vector<2xf32> to vector<2x1xf32>
    %44 = math.rsqrt %43 : vector<2x1xf32>
    %45 = vector.broadcast %44 : vector<2x1xf32> to vector<2x8xf32>
    %46 = arith.mulf %40, %45 : vector<2x8xf32>
    %47 = arith.mulf %30, %30 : vector<2x8xf32>
    %cst_24 = arith.constant dense<0.000000e+00> : vector<2xf32>
    %48 = vector.multi_reduction <add>, %47, %cst_24 [1] : vector<2x8xf32> to vector<2xf32>
    %49 = vector.shape_cast %48 : vector<2xf32> to vector<2x1xf32>
    %50 = arith.mulf %46, %46 : vector<2x8xf32>
    %cst_25 = arith.constant dense<0.000000e+00> : vector<2xf32>
    %51 = vector.multi_reduction <add>, %50, %cst_25 [1] : vector<2x8xf32> to vector<2xf32>
    %52 = vector.shape_cast %51 : vector<2xf32> to vector<2x1xf32>
    %53 = arith.mulf %30, %46 : vector<2x8xf32>
    %cst_26 = arith.constant dense<0.000000e+00> : vector<2xf32>
    %54 = vector.multi_reduction <add>, %53, %cst_26 [1] : vector<2x8xf32> to vector<2xf32>
    %55 = vector.shape_cast %54 : vector<2xf32> to vector<2x1xf32>
    %56 = arith.mulf %49, %49 : vector<2x1xf32>
    %cst_27 = arith.constant 2.000000e+00 : f32
    %57 = vector.broadcast %cst_27 : f32 to vector<2x1xf32>
    %58 = arith.mulf %57, %55 : vector<2x1xf32>
    %59 = arith.mulf %58, %55 : vector<2x1xf32>
    %60 = arith.subf %56, %59 : vector<2x1xf32>
    %61 = arith.mulf %52, %52 : vector<2x1xf32>
    %62 = arith.addf %60, %61 : vector<2x1xf32>
    %63 = vector.shape_cast %62 : vector<2x1xf32> to vector<1x2x1xf32>
    %cst_28 = arith.constant dense<0.000000e+00> : vector<1xf32>
    %64 = vector.multi_reduction <add>, %63, %cst_28 [1, 2] : vector<1x2x1xf32> to vector<1xf32>
    %65 = vector.shape_cast %64 : vector<1xf32> to vector<1x1x1xf32>
    %66 = vector.extract %65[0, 0, 0] : f32 from vector<1x1x1xf32>
    %67 = vector.broadcast %66 : f32 to vector<1x1xf32>
    %68 = vector.shape_cast %67 : vector<1x1xf32> to vector<1x1xf32>
    %69 = vector.broadcast %68 : vector<1x1xf32> to vector<8x128xf32>
    %c0_29 = arith.constant 0 : index
    %c0_30 = arith.constant 0 : index
    %70 = vector.load %arg9[%c0_29, %c0_30] : memref<8x128xf32, #tpu.memory_space<vmem>>, vector<8x128xf32>
    tpu.vector_store %arg9[%c0_29, %c0_30], %69 {strides = array<i32>} : memref<8x128xf32, #tpu.memory_space<vmem>>, vector<8x128xf32>,
    return
  }
  func.func @transform_0(%arg0: i32) -> (i32, i32) {
    %c0_i32 = arith.constant 0 : i32
    %c0_i32_0 = arith.constant 0 : i32
    return %arg0, %c0_i32 : i32, i32
  }
  func.func @transform_1(%arg0: i32) -> (i32, i32) {
    %c0_i32 = arith.constant 0 : i32
    %c0_i32_0 = arith.constant 0 : i32
    return %arg0, %c0_i32 : i32, i32
  }
  func.func @transform_2(%arg0: i32) -> (i32, i32) {
    %c0_i32 = arith.constant 0 : i32
    %c0_i32_0 = arith.constant 0 : i32
    %c0_i32_1 = arith.constant 0 : i32
    return %c0_i32, %c0_i32_0 : i32, i32
  }
  func.func @transform_3(%arg0: i32) -> (i32, i32) {
    %c0_i32 = arith.constant 0 : i32
    %c0_i32_0 = arith.constant 0 : i32
    %c0_i32_1 = arith.constant 0 : i32
    return %c0_i32, %c0_i32_0 : i32, i32
  }
  func.func @transform_4(%arg0: i32) -> (i32, i32) {
    %c0_i32 = arith.constant 0 : i32
    %c0_i32_0 = arith.constant 0 : i32
    return %arg0, %c0_i32 : i32, i32
  }
  func.func @transform_5(%arg0: i32) -> (i32, i32) {
    %c0_i32 = arith.constant 0 : i32
    %c0_i32_0 = arith.constant 0 : i32
    return %arg0, %c0_i32 : i32, i32
  }
  func.func @transform_6(%arg0: i32) -> (i32, i32) {
    %c0_i32 = arith.constant 0 : i32
    %c0_i32_0 = arith.constant 0 : i32
    return %arg0, %c0_i32 : i32, i32
  }
  func.func @transform_7(%arg0: i32) -> (i32, i32) {
    %c0_i32 = arith.constant 0 : i32
    %c0_i32_0 = arith.constant 0 : i32
    return %c0_i32, %arg0 : i32, i32
  }
  func.func @transform_8(%arg0: i32) -> (i32, i32) {
    %c0_i32 = arith.constant 0 : i32
    %c0_i32_0 = arith.constant 0 : i32
    return %arg0, %c0_i32 : i32, i32
  }
}

</mosaic_0001>

<bundles_post_ra>
// kernel: tpu_custom_call.1
= control target key start
LH: loop header
LB: loop body
LE: loop exit
PB: predicated region body
PF: predicated region fallthrough
CT: control target
= control target key end

     0   :  { %14 = vsyncpa [#allocation3], 0  ;;  %v511_v1 = vmov 0.0   ;;  %vm94_vm0 = vcmask 261120   ;;  %vm512_vm1 = vmmov 0   ;;  %v513_v6 = vmov 0   ;;  %s662_s0 = inlined_call_operand.vmem [shape: bf16[16,32], index: 0, kind: input, shape index: {}]   ;;  %s663_s1 = inlined_call_operand.vmem [shape: f32[16,1], index: 1, kind: input, shape index: {}]   ;;  %s664_s2 = inlined_call_operand.vmem [shape: bf16[128,32], index: 2, kind: input, shape index: {}]   ;;  %s665_s3 = inlined_call_operand.vmem [shape: f32[1,128], index: 3, kind: input, shape index: {}]   ;;  %s666_s4 = inlined_call_operand.vmem [shape: s32[16,1], index: 4, kind: input, shape index: {}]   ;;  %s667_s5 = inlined_call_operand.vmem [shape: f32[2,8], index: 5, kind: input, shape index: {}]   ;;  %s668_s6 = inlined_call_operand.vmem [shape: f32[2,1], index: 6, kind: input, shape index: {}]   ;;  %s669_s7 = inlined_call_operand.hbm [shape: f32[1,16], index: 7, kind: output, shape index: {0}]   ;;  %s670_s8 = inlined_call_operand.hbm [shape: f32[8,128], index: 8, kind: output, shape index: {1}]  }
   0x1   :  { %v452_v0 = vld [vmem:[%s664_s2] sm:$0xff]   ;;  %423 = vmatprep.subr.bf16.mxu0 %v511_v1  ;;  %v453_v3 = vld [vmem:[%s664_s2 + $0x8] sm:$0xff]   ;;  %439 = vmatprep.mubr.msk.bf16.mxu0 %vm512_vm1, %v511_v1 }
   0x2   :  { %v99_v2 = vsel %vm94_vm0, %v452_v0, 0  ;;  %v102_v4 = vsel %vm94_vm0, %v453_v3, 0  ;;  %v163_v5 = vld [vmem:[%s666_s4] sm:$0xff]  ;;  %450 = vset.pattern.permute.xlu0 %v513_v6  ;;  %451 = vset.pattern.permute.xlu1 %v513_v6 }
   0x3   :  { %424 = vmatpush3.bf16.xpose.msra.mxu0 %v99_v2 }
   0x4   :  { %425 = vmatprep.subr.bf16.mxu0 %v511_v1 }
   0x5   :  { %15 = vsyncpa [#allocation5], 0  ;;  %170 = vperm.xlu0 %450, %v163_v5   ;;  %v454_v7 = vld [vmem:[%s664_s2 + $0x10] sm:$0xff]   ;;  %v164_v8 = vld [vmem:[%s666_s4 + $0x8] sm:$0xff]  ;;  %v165_v21 = vlaneseq  ;;  %vm219_vm4 = vcmask 58368   ;;  %vm236_vm5 = vcmask 1041409  }
   0x6   :  { %v105_v9 = vsel %vm94_vm0, %v454_v7, 0  ;;  %v455_v10 = vld [vmem:[%s664_s2 + $0x18] sm:$0xff]   ;;  %v456_v12 = vld [vmem:[%s664_s2 + $0x20] sm:$0xff]   ;;  %v457_v14 = vld [vmem:[%s664_s2 + $0x28] sm:$0xff]   ;;  %vm211_vm6 = vcmask 130112   ;;  %vm214_vm7 = vcmask 122880  }
   0x7   :  { %v108_v11 = vsel %vm94_vm0, %v455_v10, 0  ;;  %v111_v13 = vsel %vm94_vm0, %v456_v12, 0  ;;  %v114_v15 = vsel %vm94_vm0, %v457_v14, 0  ;;  %v458_v16 = vld [vmem:[%s664_s2 + $0x30] sm:$0xff]   ;;  %v459_v18 = vld [vmem:[%s664_s2 + $0x38] sm:$0xff]   ;;  %v460_v20 = vld [vmem:[%s662_s0] sm:$0xff]  }
   0x8   :  { %v117_v17 = vsel %vm94_vm0, %v458_v16, 0  ;;  %v120_v19 = vsel %vm94_vm0, %v459_v18, 0  ;;  %v166_v22 = vand.u32 127, %v165_v21  ;;  %v413_v24 = vld [vmem:[%s665_s3] ss:$0 sm:$0xff]  ;;  %v168_v37 = vld [vmem:[%s663_s1 + $0x8] sm:$0xff] }
   0x9   :  { %173 = vperm.xlu0 %450, %v164_v8   ;;  %v167_v34 = vld [vmem:[%s663_s1] sm:$0xff]  ;;  %v203_v40 = vshrl.u32 %v165_v21, 7  ;;  %vm362_vm8 = vcmask 1024  }
   0xa   :  { %v206_v41 = vadd.s32 4294967288, %v166_v22  ;;  %v218_v52 = vld [vmem:[%s668_s6] sm:$0x3] }
   0xb   :  { %426 = vmatpush3.bf16.xpose.msra.mxu0 %v102_v4  ;;  %v612_v42 = vsub.s32 %v166_v22, %v203_v40  ;;  %v216_v53 = vld [vmem:[%s667_s5] sm:$0x3]  ;;  %v246_v56 = vsub.s32 0, %v203_v40  ;;  %v250_v57 = vsub.s32 1, %v203_v40  ;;  %s514_s5 = smov [#allocation2]  }
   0xc   :  { %427 = vmatprep.subr.bf16.mxu0 %v511_v1  ;;  %v209_v43 = vsub.s32 %v206_v41, %v203_v40  ;;  %v217_v54 = vsub.f32 1.0, %v216_v53  ;;  %s381_s6 = sshll.u32 %s514_s5, 4  ;;  %s382_s6 = int_to_ptr.vmem [resolvable:$true] %s381_s6 }
   0xd   :  { %s463_s10 = scalar_lea.vmem %s382_s6, 16  ;;  %s467_s11 = scalar_lea.vmem %s382_s6, 32 }
   0xe   :  { %v220_v55 = vsel %vm219_vm4, %v217_v54, 0.0  ;;  %p464_p0 = scmp.ne.s32.totalorder %s382_s6, %s463_s10  ;;  %p468_p1 = scmp.lt.s32.totalorder %s382_s6, %s382_s6 }
   0xf   :  { %p469_p2 = scmp.lt.s32.totalorder %s467_s11, %s463_s10 }
  0x11   :  { %p470_p3 = por %p469_p2, %p468_p1 }
  0x13   :  { %428 = vmatpush3.bf16.xpose.msra.mxu0 %v105_v9  ;;  %p471_p4 = pnand %p470_p3, %p464_p0 }
  0x14   :  { %429 = vmatprep.subr.bf16.mxu0 %v511_v1 }
  0x1b   :  { %430 = vmatpush3.bf16.xpose.msra.mxu0 %v108_v11 }
  0x1c   :  { %431 = vmatprep.subr.bf16.mxu0 %v511_v1 }
  0x23   :  { %432 = vmatpush3.bf16.xpose.msra.mxu0 %v111_v13 }
  0x24   :  { %433 = vmatprep.subr.bf16.mxu0 %v511_v1 }
  0x2b   :  { %434 = vmatpush3.bf16.xpose.msra.mxu0 %v114_v15 }
  0x2c   :  { %435 = vmatprep.subr.bf16.mxu0 %v511_v1 }
  0x33   :  { %436 = vmatpush3.bf16.xpose.msra.mxu0 %v117_v17 }
  0x34   :  { %437 = vmatprep.subr.bf16.mxu0 %v511_v1 }
  0x3b   :  { %438 = vmatpush3.bf16.xpose.msra.mxu0 %v120_v19 }
  0x42   :  { %440 = vmatmul.mubr.msk.bf16.vlgmr.msra.gmra.mrb[0].mxu0 %vm94_vm0, %v460_v20 }
  0x84   :  { %v171_v23 = vpop.permute.xlu0 %170 }
  0x85   :  { %vm175_vm2 = vcmp.eq.s32.totalorder %v171_v23, %v166_v22 }
  0x88   :  { %v174_v29 = vpop.permute.xlu0 %173 }
  0x89   :  { %vm176_vm3 = vcmp.eq.s32.totalorder %v174_v29, %v166_v22 }
 0x115   :  { %v156_v25 = vpop.f32.mrb[0].mxu0 }
 0x116   :  { %v184_v26 = vadd.f32 %v413_v24, %v156_v25  ;;  %v441_v27 = vpop.f32.mrb[1].mxu0 }
 0x117   :  { %v159_v28 = vpop.f32.mrb[2].mxu0 }
 0x118   :  { %v185_v30 = vadd.f32 %v413_v24, %v159_v28  ;;  %v442_v31 = vpop.f32.mrb[3].mxu0  ;;  %v186_v32 = vsel %vm175_vm2, %v184_v26, 0.0 }
 0x119   :  { %188 = vadd.xlane.f32.xlu1 %v186_v32 }
 0x11a   :  { %v187_v33 = vsel %vm176_vm3, %v185_v30, 0.0 }
 0x11d   :  { %190 = vadd.xlane.f32.xlu1 %v187_v33 }
 0x1a6   :  { %v189_v35 = vpop.xlane.xlu1 %188 }
 0x1a7   :  { %v192_v36 = vadd.f32 %v189_v35, %v167_v34 }
 0x1a9   :  { %197 = vperm.xlu0 %450, %v192_v36  }
 0x1aa   :  { %v191_v38 = vpop.xlane.xlu1 %190 }
 0x1ab   :  { %v193_v39 = vadd.f32 %v191_v38, %v168_v37 }
 0x1ad   :  { %200 = vperm.xlu1 %451, %v193_v39  }
 0x228   :  { %v198_v44 = vpop.permute.xlu0 %197 }
 0x229   :  { %v205_v46 = vrot.slane %v198_v44, %v612_v42 }
 0x22c   :  { %v201_v45 = vpop.permute.xlu1 %200 }
 0x22d   :  { %v210_v47 = vrot.slane %v201_v45, %v209_v43  ;;  %v235_v48 = vrot.slane %v201_v45, %v612_v42 }
 0x22f   :  { %v237_v49 = vsel %vm236_vm5, %v235_v48, %v205_v46  ;;  %v212_v50 = vsel %vm211_vm6, %v210_v47, %v205_v46 }
 0x230   :  { %v239_v51 = vsel %vm219_vm4, %v237_v49, 0.0  ;;  %215 = vst.msk [vmem:[#allocation2] sm:$0x1] %vm214_vm7, %v212_v50 }
 0x231   :  { %240 = vadd.xlane.f32.xlu0 %v239_v51 }
 0x247   :  { %228 = vperm.xlu0 %450, %v218_v52  }
 0x266   :  { %221 = vadd.xlane.f32.xlu0 %v220_v55 }
 0x2be   :  { %v241_v58 = vpop.xlane.xlu0 %240 }
 0x2bf   :  { %v242_v59 = vmul.f32 0.125, %v241_v58 }
 0x2c1   :  { %v247_v60 = vrot.slane %v242_v59, %v246_v56  ;;  %v251_v61 = vrot.slane %v242_v59, %v250_v57 }
 0x2c3   :  { %v254_v62 = vsub.f32 %v192_v36, %v247_v60  ;;  %v255_v63 = vsub.f32 %v193_v39, %v251_v61 }
 0x2c5   :  { %v256_v0 = vadd.f32 1e-05, %v254_v62  ;;  %v257_v1 = vadd.f32 1e-05, %v255_v63 }
 0x2c6   :  { %v229_v11 = vpop.permute.xlu0 %228 }
 0x2c7   :  { %v270_v2 = vmul.f32 %v256_v0, %v256_v0  ;;  %v271_v3 = vmul.f32 %v257_v1, %v257_v1  ;;  %v261_v12 = vrot.slane %v229_v11, %v246_v56  ;;  %v265_v14 = vrot.slane %v229_v11, %v250_v57 }
 0x2c9   :  { %275 = vperm.xlu1 %451, %v270_v2   ;;  %v268_v15 = vmul.f32 %v261_v12, %v256_v0  ;;  %v269_v19 = vmul.f32 %v265_v14, %v257_v1 }
 0x2cd   :  { %278 = vperm.xlu1 %451, %v271_v3  }
 0x2f3   :  { %v222_v23 = vpop.xlane.xlu0 %221 }
 0x2f4   :  { %v224_v24 = vmul.f32 0.125, %v222_v23 }
 0x2f6   :  { %v225_v25 = vsub.f32 %v217_v54, %v224_v24 }
 0x2f8   :  { %v231_v26 = vmul.f32 %v229_v11, %v225_v25 }
 0x2fa   :  { %v307_v27 = vmul.f32 %v231_v26, %v231_v26 }
 0x2fc   :  { %v308_v28 = vsel %vm219_vm4, %v307_v27, 0.0 }
 0x348   :  { %v276_v4 = vpop.permute.xlu1 %275 }
 0x349   :  { %v283_v6 = vrot.slane %v276_v4, %v612_v42 }
 0x34c   :  { %v279_v5 = vpop.permute.xlu1 %278 }
 0x34d   :  { %v287_v7 = vrot.slane %v279_v5, %v612_v42 }
 0x34f   :  { %v288_v8 = vsel %vm236_vm5, %v287_v7, %v283_v6 }
 0x350   :  { %v290_v9 = vsel %vm219_vm4, %v288_v8, 0.0 }
 0x351   :  { %291 = vadd.xlane.f32.xlu1 %v290_v9 }
 0x3de   :  { %v292_v10 = vpop.xlane.xlu1 %291 }
 0x3df   :  { %461 = vrsqrt.f32 %v292_v10 }
 0x3e9   :  { %v462_v13 = vpop.eup %461 }
 0x3ea   :  { %v298_v16 = vrot.slane %v462_v13, %v246_v56  ;;  %v302_v18 = vrot.slane %v462_v13, %v250_v57 }
 0x3ec   :  { %v305_v17 = vmul.f32 %v298_v16, %v268_v15  ;;  %v306_v20 = vmul.f32 %v302_v18, %v269_v19 }
 0x3ee   :  { %337 = vperm.xlu1 %451, %v305_v17   ;;  %v311_v21 = vmul.f32 %v305_v17, %v305_v17  ;;  %v312_v22 = vmul.f32 %v306_v20, %v306_v20 }
 0x3f2   :  { %340 = vperm.xlu1 %451, %v306_v20  }
 0x3f6   :  { %316 = vperm.xlu1 %451, %v311_v21  }
 0x3fa   :  { %319 = vperm.xlu1 %451, %v312_v22  }
 0x41e   :  { %309 = vadd.xlane.f32.xlu1 %v308_v28 }
 0x46d   :  { %v338_v29 = vpop.permute.xlu1 %337 }
 0x46e   :  { %v345_v31 = vrot.slane %v338_v29, %v612_v42 }
 0x471   :  { %v341_v30 = vpop.permute.xlu1 %340 }
 0x472   :  { %v349_v32 = vrot.slane %v341_v30, %v612_v42 }
 0x474   :  { %v350_v33 = vsel %vm236_vm5, %v349_v32, %v345_v31 }
 0x475   :  { %v317_v34 = vpop.permute.xlu1 %316  ;;  %v352_v35 = vmul.f32 %v350_v33, %v231_v26 }
 0x476   :  { %v324_v38 = vrot.slane %v317_v34, %v612_v42 }
 0x477   :  { %v353_v36 = vsel %vm219_vm4, %v352_v35, 0.0 }
 0x478   :  { %354 = vadd.xlane.f32.xlu0 %v353_v36 }
 0x479   :  { %v320_v37 = vpop.permute.xlu1 %319 }
 0x47a   :  { %v328_v39 = vrot.slane %v320_v37, %v612_v42 }
 0x47c   :  { %v329_v40 = vsel %vm236_vm5, %v328_v39, %v324_v38 }
 0x47d   :  { %v331_v41 = vsel %vm219_vm4, %v329_v40, 0.0 }
 0x47e   :  { %332 = vadd.xlane.f32.xlu0 %v331_v41 }
 0x4ab   :  { %v310_v45 = vpop.xlane.xlu1 %309 }
 0x4ac   :  { %v356_v47 = vmul.f32 %v310_v45, %v310_v45 }
 0x505   :  { %v355_v43 = vpop.xlane.xlu0 %354 }
 0x506   :  { %v357_v44 = vmul.f32 2.0, %v355_v43 }
 0x508   :  { %v358_v46 = vmul.f32 %v357_v44, %v355_v43 }
 0x50a   :  { %v359_v49 = vsub.f32 %v356_v47, %v358_v46 }
 0x50b   :  { %v333_v48 = vpop.xlane.xlu0 %332 }
 0x50c   :  { %v360_v50 = vmul.f32 %v333_v48, %v333_v48 }
 0x50e   :  { %v361_v51 = vadd.f32 %v360_v50, %v359_v49 }
 0x510   :  { %v363_v52 = vsel %vm362_vm8, %v361_v51, 0.0 }
 0x511   :  { %364 = vadd.xlane.f32.xlu0 %v363_v52 }
 0x512   :  { %474 = shalt.err (!%p471_p4)
}
 0x513   :  { %s475_s14 = scalar_lea.hbm %s669_s7, 16 }
 0x514   :  { %p476_p5 = scmp.ne.s32.totalorder %s669_s7, %s475_s14  ;;  %p479_p6 = scmp.lt.u32.totalorder %s475_s14, %s669_s7 }
 0x516   :  { %p481_p7 = pnand %p479_p6, %p476_p5 }
 0x518   :  { %484 = shalt.err (!%p481_p7)
}
 0x519   :  { %384 = dma.vmem_to_hbm [thread:$0]  %s382_s6, 16, %s669_s7, [#allocation3]  }
 0x51a   :  { %s515_s20 = smov [#allocation4]  }
 0x51b   :  { %s391_s21 = sshll.u32 %s515_s20, 4  ;;  %s392_s21 = int_to_ptr.vmem [resolvable:$true] %s391_s21 }
 0x51c   :  { %s485_s23 = scalar_lea.vmem %s392_s21, 128  ;;  %p490_p9 = scmp.lt.s32.totalorder %s392_s21, %s392_s21 }
 0x51d   :  { %p486_p8 = scmp.ne.s32.totalorder %s392_s21, %s485_s23  ;;  %p491_p10 = scmp.lt.s32.totalorder %s485_s23, %s485_s23 }
 0x51f   :  { %p492_p11 = por %p491_p10, %p490_p9 }
 0x521   :  { %p493_p12 = pnand %p492_p11, %p486_p8 }
 0x59e   :  { %v365_v42 = vpop.xlane.xlu0 %364 }
 0x59f   :  { %v366_v53 = vrot.slane %v365_v42, 4 }
 0x5a1   :  { %v367_v54 = vadd.f32 %v366_v53, %v365_v42 }
 0x5a3   :  { %v368_v55 = vrot.slane %v367_v54, 2 }
 0x5a5   :  { %v369_v56 = vadd.f32 %v368_v55, %v367_v54 }
 0x5a7   :  { %v370_v57 = vrot.slane %v369_v56, 1 }
 0x5a9   :  { %v371_v58 = vadd.f32 %v370_v57, %v369_v56 }
 0x5ab   :  { %443 = vpush %v371_v58 }
 0x5dc   :  { %s444_s22 = spop %443 }
 0x5dd   :  { %v373_v59 = vstv %s444_s22 }
 0x5de   :  { %374 = vst [vmem:[#allocation4] sm:$0xff] %v373_v59 }
 0x5df   :  { %496 = shalt.err (!%p493_p12)
}
 0x5e0   :  { %s497_s25 = scalar_lea.hbm %s670_s8, 128 }
 0x5e1   :  { %p498_p13 = scmp.ne.s32.totalorder %s670_s8, %s497_s25  ;;  %p501_p0 = scmp.lt.u32.totalorder %s497_s25, %s670_s8 }
 0x5e3   :  { %p503_p1 = pnand %p501_p0, %p498_p13 }
 0x5e5   :  { %506 = shalt.err (!%p503_p1)
}
 0x5e6   :  { %394 = dma.vmem_to_hbm [thread:$0]  %s392_s21, 128, %s670_s8, [#allocation5]  }
 0x5e7   :  { %507 = dma.done.wait [#allocation3], 16  }
 0x5e8   :  { %508 = vsyncadd [#allocation3], 4294967280 }
 0x5e9   :  { %509 = dma.done.wait [#allocation5], 128  }
 0x5ea   :  { %510 = vsyncadd [#allocation5], 4294967168 }
 0x5eb   :  { %401 = vsyncpa [#allocation3], 1 }
 0x5ec   :  { %402 = vsyncpa [#allocation5], 1 }

// kernel: tpu_custom_call.1
= control target key start
LH: loop header
LB: loop body
LE: loop exit
PB: predicated region body
PF: predicated region fallthrough
CT: control target
= control target key end

     0   :  { %14 = vsyncpa [#allocation3], 0  ;;  %v511_v1 = vmov 0.0   ;;  %vm94_vm0 = vcmask 261120   ;;  %vm512_vm1 = vmmov 0   ;;  %v513_v6 = vmov 0   ;;  %s662_s0 = inlined_call_operand.vmem [shape: bf16[16,32], index: 0, kind: input, shape index: {}]   ;;  %s663_s1 = inlined_call_operand.vmem [shape: f32[16,1], index: 1, kind: input, shape index: {}]   ;;  %s664_s2 = inlined_call_operand.vmem [shape: bf16[128,32], index: 2, kind: input, shape index: {}]   ;;  %s665_s3 = inlined_call_operand.vmem [shape: f32[1,128], index: 3, kind: input, shape index: {}]   ;;  %s666_s4 = inlined_call_operand.vmem [shape: s32[16,1], index: 4, kind: input, shape index: {}]   ;;  %s667_s5 = inlined_call_operand.vmem [shape: f32[2,8], index: 5, kind: input, shape index: {}]   ;;  %s668_s6 = inlined_call_operand.vmem [shape: f32[2,1], index: 6, kind: input, shape index: {}]   ;;  %s669_s7 = inlined_call_operand.hbm [shape: f32[1,16], index: 7, kind: output, shape index: {0}]   ;;  %s670_s8 = inlined_call_operand.hbm [shape: f32[8,128], index: 8, kind: output, shape index: {1}]  }
   0x1   :  { %v452_v0 = vld [vmem:[%s664_s2] sm:$0xff]   ;;  %423 = vmatprep.subr.bf16.mxu0 %v511_v1  ;;  %v453_v3 = vld [vmem:[%s664_s2 + $0x8] sm:$0xff]   ;;  %439 = vmatprep.mubr.msk.bf16.mxu0 %vm512_vm1, %v511_v1 }
   0x2   :  { %v99_v2 = vsel %vm94_vm0, %v452_v0, 0  ;;  %v102_v4 = vsel %vm94_vm0, %v453_v3, 0  ;;  %v163_v5 = vld [vmem:[%s666_s4] sm:$0xff]  ;;  %450 = vset.pattern.permute.xlu0 %v513_v6  ;;  %451 = vset.pattern.permute.xlu1 %v513_v6 }
   0x3   :  { %424 = vmatpush3.bf16.xpose.msra.mxu0 %v99_v2 }
   0x4   :  { %425 = vmatprep.subr.bf16.mxu0 %v511_v1 }
   0x5   :  { %15 = vsyncpa [#allocation5], 0  ;;  %170 = vperm.xlu0 %450, %v163_v5   ;;  %v454_v7 = vld [vmem:[%s664_s2 + $0x10] sm:$0xff]   ;;  %v164_v8 = vld [vmem:[%s666_s4 + $0x8] sm:$0xff]  ;;  %v165_v21 = vlaneseq  ;;  %vm219_vm4 = vcmask 58368   ;;  %vm236_vm5 = vcmask 1041409  }
   0x6   :  { %v105_v9 = vsel %vm94_vm0, %v454_v7, 0  ;;  %v455_v10 = vld [vmem:[%s664_s2 + $0x18] sm:$0xff]   ;;  %v456_v12 = vld [vmem:[%s664_s2 + $0x20] sm:$0xff]   ;;  %v457_v14 = vld [vmem:[%s664_s2 + $0x28] sm:$0xff]   ;;  %vm211_vm6 = vcmask 130112   ;;  %vm214_vm7 = vcmask 122880  }
   0x7   :  { %v108_v11 = vsel %vm94_vm0, %v455_v10, 0  ;;  %v111_v13 = vsel %vm94_vm0, %v456_v12, 0  ;;  %v114_v15 = vsel %vm94_vm0, %v457_v14, 0  ;;  %v458_v16 = vld [vmem:[%s664_s2 + $0x30] sm:$0xff]   ;;  %v459_v18 = vld [vmem:[%s664_s2 + $0x38] sm:$0xff]   ;;  %v460_v20 = vld [vmem:[%s662_s0] sm:$0xff]  }
   0x8   :  { %v117_v17 = vsel %vm94_vm0, %v458_v16, 0  ;;  %v120_v19 = vsel %vm94_vm0, %v459_v18, 0  ;;  %v166_v22 = vand.u32 127, %v165_v21  ;;  %v413_v24 = vld [vmem:[%s665_s3] ss:$0 sm:$0xff]  ;;  %v168_v37 = vld [vmem:[%s663_s1 + $0x8] sm:$0xff] }
   0x9   :  { %173 = vperm.xlu0 %450, %v164_v8   ;;  %v167_v34 = vld [vmem:[%s663_s1] sm:$0xff]  ;;  %v203_v40 = vshrl.u32 %v165_v21, 7  ;;  %vm362_vm8 = vcmask 1024  }
   0xa   :  { %v206_v41 = vadd.s32 4294967288, %v166_v22  ;;  %v218_v52 = vld [vmem:[%s668_s6] sm:$0x3] }
   0xb   :  { %426 = vmatpush3.bf16.xpose.msra.mxu0 %v102_v4  ;;  %v612_v42 = vsub.s32 %v166_v22, %v203_v40  ;;  %v216_v53 = vld [vmem:[%s667_s5] sm:$0x3]  ;;  %v246_v56 = vsub.s32 0, %v203_v40  ;;  %v250_v57 = vsub.s32 1, %v203_v40  ;;  %s514_s5 = smov [#allocation2]  }
   0xc   :  { %427 = vmatprep.subr.bf16.mxu0 %v511_v1  ;;  %v209_v43 = vsub.s32 %v206_v41, %v203_v40  ;;  %v217_v54 = vsub.f32 1.0, %v216_v53  ;;  %s381_s6 = sshll.u32 %s514_s5, 4  ;;  %s382_s6 = int_to_ptr.vmem [resolvable:$true] %s381_s6 }
   0xd   :  { %s463_s10 = scalar_lea.vmem %s382_s6, 16  ;;  %s467_s11 = scalar_lea.vmem %s382_s6, 32 }
   0xe   :  { %v220_v55 = vsel %vm219_vm4, %v217_v54, 0.0  ;;  %p464_p0 = scmp.ne.s32.totalorder %s382_s6, %s463_s10  ;;  %p468_p1 = scmp.lt.s32.totalorder %s382_s6, %s382_s6 }
   0xf   :  { %p469_p2 = scmp.lt.s32.totalorder %s467_s11, %s463_s10 }
  0x11   :  { %p470_p3 = por %p469_p2, %p468_p1 }
  0x13   :  { %428 = vmatpush3.bf16.xpose.msra.mxu0 %v105_v9  ;;  %p471_p4 = pnand %p470_p3, %p464_p0 }
  0x14   :  { %429 = vmatprep.subr.bf16.mxu0 %v511_v1 }
  0x1b   :  { %430 = vmatpush3.bf16.xpose.msra.mxu0 %v108_v11 }
  0x1c   :  { %431 = vmatprep.subr.bf16.mxu0 %v511_v1 }
  0x23   :  { %432 = vmatpush3.bf16.xpose.msra.mxu0 %v111_v13 }
  0x24   :  { %433 = vmatprep.subr.bf16.mxu0 %v511_v1 }
  0x2b   :  { %434 = vmatpush3.bf16.xpose.msra.mxu0 %v114_v15 }
  0x2c   :  { %435 = vmatprep.subr.bf16.mxu0 %v511_v1 }
  0x33   :  { %436 = vmatpush3.bf16.xpose.msra.mxu0 %v117_v17 }
  0x34   :  { %437 = vmatprep.subr.bf16.mxu0 %v511_v1 }
  0x3b   :  { %438 = vmatpush3.bf16.xpose.msra.mxu0 %v120_v19 }
  0x42   :  { %440 = vmatmul.mubr.msk.bf16.vlgmr.msra.gmra.mrb[0].mxu0 %vm94_vm0, %v460_v20 }
  0x84   :  { %v171_v23 = vpop.permute.xlu0 %170 }
  0x85   :  { %vm175_vm2 = vcmp.eq.s32.totalorder %v171_v23, %v166_v22 }
  0x88   :  { %v174_v29 = vpop.permute.xlu0 %173 }
  0x89   :  { %vm176_vm3 = vcmp.eq.s32.totalorder %v174_v29, %v166_v22 }
 0x115   :  { %v156_v25 = vpop.f32.mrb[0].mxu0 }
 0x116   :  { %v184_v26 = vadd.f32 %v413_v24, %v156_v25  ;;  %v441_v27 = vpop.f32.mrb[1].mxu0 }
 0x117   :  { %v159_v28 = vpop.f32.mrb[2].mxu0 }
 0x118   :  { %v185_v30 = vadd.f32 %v413_v24, %v159_v28  ;;  %v442_v31 = vpop.f32.mrb[3].mxu0  ;;  %v186_v32 = vsel %vm175_vm2, %v184_v26, 0.0 }
 0x119   :  { %188 = vadd.xlane.f32.xlu1 %v186_v32 }
 0x11a   :  { %v187_v33 = vsel %vm176_vm3, %v185_v30, 0.0 }
 0x11d   :  { %190 = vadd.xlane.f32.xlu1 %v187_v33 }
 0x1a6   :  { %v189_v35 = vpop.xlane.xlu1 %188 }
 0x1a7   :  { %v192_v36 = vadd.f32 %v189_v35, %v167_v34 }
 0x1a9   :  { %197 = vperm.xlu0 %450, %v192_v36  }
 0x1aa   :  { %v191_v38 = vpop.xlane.xlu1 %190 }
 0x1ab   :  { %v193_v39 = vadd.f32 %v191_v38, %v168_v37 }
 0x1ad   :  { %200 = vperm.xlu1 %451, %v193_v39  }
 0x228   :  { %v198_v44 = vpop.permute.xlu0 %197 }
 0x229   :  { %v205_v46 = vrot.slane %v198_v44, %v612_v42 }
 0x22c   :  { %v201_v45 = vpop.permute.xlu1 %200 }
 0x22d   :  { %v210_v47 = vrot.slane %v201_v45, %v209_v43  ;;  %v235_v48 = vrot.slane %v201_v45, %v612_v42 }
 0x22f   :  { %v237_v49 = vsel %vm236_vm5, %v235_v48, %v205_v46  ;;  %v212_v50 = vsel %vm211_vm6, %v210_v47, %v205_v46 }
 0x230   :  { %v239_v51 = vsel %vm219_vm4, %v237_v49, 0.0  ;;  %215 = vst.msk [vmem:[#allocation2] sm:$0x1] %vm214_vm7, %v212_v50 }
 0x231   :  { %240 = vadd.xlane.f32.xlu0 %v239_v51 }
 0x247   :  { %228 = vperm.xlu0 %450, %v218_v52  }
 0x266   :  { %221 = vadd.xlane.f32.xlu0 %v220_v55 }
 0x2be   :  { %v241_v58 = vpop.xlane.xlu0 %240 }
 0x2bf   :  { %v242_v59 = vmul.f32 0.125, %v241_v58 }
 0x2c1   :  { %v247_v60 = vrot.slane %v242_v59, %v246_v56  ;;  %v251_v61 = vrot.slane %v242_v59, %v250_v57 }
 0x2c3   :  { %v254_v62 = vsub.f32 %v192_v36, %v247_v60  ;;  %v255_v63 = vsub.f32 %v193_v39, %v251_v61 }
 0x2c5   :  { %v256_v0 = vadd.f32 1e-05, %v254_v62  ;;  %v257_v1 = vadd.f32 1e-05, %v255_v63 }
 0x2c6   :  { %v229_v11 = vpop.permute.xlu0 %228 }
 0x2c7   :  { %v270_v2 = vmul.f32 %v256_v0, %v256_v0  ;;  %v271_v3 = vmul.f32 %v257_v1, %v257_v1  ;;  %v261_v12 = vrot.slane %v229_v11, %v246_v56  ;;  %v265_v14 = vrot.slane %v229_v11, %v250_v57 }
 0x2c9   :  { %275 = vperm.xlu1 %451, %v270_v2   ;;  %v268_v15 = vmul.f32 %v261_v12, %v256_v0  ;;  %v269_v19 = vmul.f32 %v265_v14, %v257_v1 }
 0x2cd   :  { %278 = vperm.xlu1 %451, %v271_v3  }
 0x2f3   :  { %v222_v23 = vpop.xlane.xlu0 %221 }
 0x2f4   :  { %v224_v24 = vmul.f32 0.125, %v222_v23 }
 0x2f6   :  { %v225_v25 = vsub.f32 %v217_v54, %v224_v24 }
 0x2f8   :  { %v231_v26 = vmul.f32 %v229_v11, %v225_v25 }
 0x2fa   :  { %v307_v27 = vmul.f32 %v231_v26, %v231_v26 }
 0x2fc   :  { %v308_v28 = vsel %vm219_vm4, %v307_v27, 0.0 }
 0x348   :  { %v276_v4 = vpop.permute.xlu1 %275 }
 0x349   :  { %v283_v6 = vrot.slane %v276_v4, %v612_v42 }
 0x34c   :  { %v279_v5 = vpop.permute.xlu1 %278 }
 0x34d   :  { %v287_v7 = vrot.slane %v279_v5, %v612_v42 }
 0x34f   :  { %v288_v8 = vsel %vm236_vm5, %v287_v7, %v283_v6 }
 0x350   :  { %v290_v9 = vsel %vm219_vm4, %v288_v8, 0.0 }
 0x351   :  { %291 = vadd.xlane.f32.xlu1 %v290_v9 }
 0x3de   :  { %v292_v10 = vpop.xlane.xlu1 %291 }
 0x3df   :  { %461 = vrsqrt.f32 %v292_v10 }
 0x3e9   :  { %v462_v13 = vpop.eup %461 }
 0x3ea   :  { %v298_v16 = vrot.slane %v462_v13, %v246_v56  ;;  %v302_v18 = vrot.slane %v462_v13, %v250_v57 }
 0x3ec   :  { %v305_v17 = vmul.f32 %v298_v16, %v268_v15  ;;  %v306_v20 = vmul.f32 %v302_v18, %v269_v19 }
 0x3ee   :  { %337 = vperm.xlu1 %451, %v305_v17   ;;  %v311_v21 = vmul.f32 %v305_v17, %v305_v17  ;;  %v312_v22 = vmul.f32 %v306_v20, %v306_v20 }
 0x3f2   :  { %340 = vperm.xlu1 %451, %v306_v20  }
 0x3f6   :  { %316 = vperm.xlu1 %451, %v311_v21  }
 0x3fa   :  { %319 = vperm.xlu1 %451, %v312_v22  }
 0x41e   :  { %309 = vadd.xlane.f32.xlu1 %v308_v28 }
 0x46d   :  { %v338_v29 = vpop.permute.xlu1 %337 }
 0x46e   :  { %v345_v31 = vrot.slane %v338_v29, %v612_v42 }
 0x471   :  { %v341_v30 = vpop.permute.xlu1 %340 }
 0x472   :  { %v349_v32 = vrot.slane %v341_v30, %v612_v42 }
 0x474   :  { %v350_v33 = vsel %vm236_vm5, %v349_v32, %v345_v31 }
 0x475   :  { %v317_v34 = vpop.permute.xlu1 %316  ;;  %v352_v35 = vmul.f32 %v350_v33, %v231_v26 }
 0x476   :  { %v324_v38 = vrot.slane %v317_v34, %v612_v42 }
 0x477   :  { %v353_v36 = vsel %vm219_vm4, %v352_v35, 0.0 }
 0x478   :  { %354 = vadd.xlane.f32.xlu0 %v353_v36 }
 0x479   :  { %v320_v37 = vpop.permute.xlu1 %319 }
 0x47a   :  { %v328_v39 = vrot.slane %v320_v37, %v612_v42 }
 0x47c   :  { %v329_v40 = vsel %vm236_vm5, %v328_v39, %v324_v38 }
 0x47d   :  { %v331_v41 = vsel %vm219_vm4, %v329_v40, 0.0 }
 0x47e   :  { %332 = vadd.xlane.f32.xlu0 %v331_v41 }
 0x4ab   :  { %v310_v45 = vpop.xlane.xlu1 %309 }
 0x4ac   :  { %v356_v47 = vmul.f32 %v310_v45, %v310_v45 }
 0x505   :  { %v355_v43 = vpop.xlane.xlu0 %354 }
 0x506   :  { %v357_v44 = vmul.f32 2.0, %v355_v43 }
 0x508   :  { %v358_v46 = vmul.f32 %v357_v44, %v355_v43 }
 0x50a   :  { %v359_v49 = vsub.f32 %v356_v47, %v358_v46 }
 0x50b   :  { %v333_v48 = vpop.xlane.xlu0 %332 }
 0x50c   :  { %v360_v50 = vmul.f32 %v333_v48, %v333_v48 }
 0x50e   :  { %v361_v51 = vadd.f32 %v360_v50, %v359_v49 }
 0x510   :  { %v363_v52 = vsel %vm362_vm8, %v361_v51, 0.0 }
 0x511   :  { %364 = vadd.xlane.f32.xlu0 %v363_v52 }
 0x512   :  { %474 = shalt.err (!%p471_p4)
}
 0x513   :  { %s475_s14 = scalar_lea.hbm %s669_s7, 16 }
 0x514   :  { %p476_p5 = scmp.ne.s32.totalorder %s669_s7, %s475_s14  ;;  %p479_p6 = scmp.lt.u32.totalorder %s475_s14, %s669_s7 }
 0x516   :  { %p481_p7 = pnand %p479_p6, %p476_p5 }
 0x518   :  { %484 = shalt.err (!%p481_p7)
}
 0x519   :  { %384 = dma.vmem_to_hbm [thread:$0]  %s382_s6, 16, %s669_s7, [#allocation3]  }
 0x51a   :  { %s515_s20 = smov [#allocation4]  }
 0x51b   :  { %s391_s21 = sshll.u32 %s515_s20, 4  ;;  %s392_s21 = int_to_ptr.vmem [resolvable:$true] %s391_s21 }
 0x51c   :  { %s485_s23 = scalar_lea.vmem %s392_s21, 128  ;;  %p490_p9 = scmp.lt.s32.totalorder %s392_s21, %s392_s21 }
 0x51d   :  { %p486_p8 = scmp.ne.s32.totalorder %s392_s21, %s485_s23  ;;  %p491_p10 = scmp.lt.s32.totalorder %s485_s23, %s485_s23 }
 0x51f   :  { %p492_p11 = por %p491_p10, %p490_p9 }
 0x521   :  { %p493_p12 = pnand %p492_p11, %p486_p8 }
 0x59e   :  { %v365_v42 = vpop.xlane.xlu0 %364 }
 0x59f   :  { %v366_v53 = vrot.slane %v365_v42, 4 }
 0x5a1   :  { %v367_v54 = vadd.f32 %v366_v53, %v365_v42 }
 0x5a3   :  { %v368_v55 = vrot.slane %v367_v54, 2 }
 0x5a5   :  { %v369_v56 = vadd.f32 %v368_v55, %v367_v54 }
 0x5a7   :  { %v370_v57 = vrot.slane %v369_v56, 1 }
 0x5a9   :  { %v371_v58 = vadd.f32 %v370_v57, %v369_v56 }
 0x5ab   :  { %443 = vpush %v371_v58 }
 0x5dc   :  { %s444_s22 = spop %443 }
 0x5dd   :  { %v373_v59 = vstv %s444_s22 }
 0x5de   :  { %374 = vst [vmem:[#allocation4] sm:$0xff] %v373_v59 }
 0x5df   :  { %496 = shalt.err (!%p493_p12)
}
 0x5e0   :  { %s497_s25 = scalar_lea.hbm %s670_s8, 128 }
 0x5e1   :  { %p498_p13 = scmp.ne.s32.totalorder %s670_s8, %s497_s25  ;;  %p501_p0 = scmp.lt.u32.totalorder %s497_s25, %s670_s8 }
 0x5e3   :  { %p503_p1 = pnand %p501_p0, %p498_p13 }
 0x5e5   :  { %506 = shalt.err (!%p503_p1)
}
 0x5e6   :  { %394 = dma.vmem_to_hbm [thread:$0]  %s392_s21, 128, %s670_s8, [#allocation5]  }
 0x5e7   :  { %507 = dma.done.wait [#allocation3], 16  }
 0x5e8   :  { %508 = vsyncadd [#allocation3], 4294967280 }
 0x5e9   :  { %509 = dma.done.wait [#allocation5], 128  }
 0x5ea   :  { %510 = vsyncadd [#allocation5], 4294967168 }
 0x5eb   :  { %401 = vsyncpa [#allocation3], 1 }
 0x5ec   :  { %402 = vsyncpa [#allocation5], 1 }

</bundles_post_ra>
